<compile_context>
chip_gen: v6e
topology: v6e:2x2x1
jax: 0.10.0
libtpu: 0.0.40
codegen_flags: <defaults>
</compile_context>

<pallas_src>
import functools

import jax
import jax.numpy as jnp
from jax.experimental import pallas as pl
from jax.experimental.pallas import tpu as pltpu


# ---------------------------------------------------------------------------
# Fused kernel: whole MLP for one batch tile.
# refs = (x, beta, w0x, w0b, b0, [w_i, b_i]*(n_hidden-1), w_head, b_head, out)
# ---------------------------------------------------------------------------
def _fused_mlp_kernel(*refs, n_hidden, negative_slope, matmul_dtype):
    x_ref, beta_ref, w0x_ref, w0b_ref, b0_ref = refs[:5]
    out_ref = refs[-1]
    rest = refs[5:-1]
    hidden_refs = [(rest[2 * i], rest[2 * i + 1]) for i in range(n_hidden - 1)]
    w_head_ref = rest[2 * (n_hidden - 1)]
    b_head_ref = rest[2 * (n_hidden - 1) + 1]

    def mm(a, b):
        # Optional bf16 MXU inputs (v6e/v7x); accumulate in f32 either way.
        if matmul_dtype is not None:
            a = a.astype(matmul_dtype)
            b = b.astype(matmul_dtype)
        return jnp.dot(a, b, preferred_element_type=jnp.float32)

    def leaky_relu(h):
        return jnp.where(h > 0, h, negative_slope * h)

    # Layer 0: fused concat(x, beta) @ W0 + b0, then LeakyReLU (f32 VPU math).
    h = mm(x_ref[...], w0x_ref[...]) + mm(beta_ref[...], w0b_ref[...]) + b0_ref[...]
    h = leaky_relu(h)

    # Remaining hidden layers; activations stay in vregs/VMEM, never HBM.
    for w_ref, b_ref in hidden_refs:
        h = leaky_relu(mm(h, w_ref[...]) + b_ref[...])

    # All output heads fused into one lane-dense (tile_b, out_pad) store.
    y = mm(h, w_head_ref[...]) + b_head_ref[...]
    out_ref[...] = y.astype(out_ref.dtype)


# ---------------------------------------------------------------------------
# Parameter construction / preparation
# ---------------------------------------------------------------------------
def init_params(key, in_dim, out_dims, nn_arch):
    """PyTorch-Linear-style uniform(-1/sqrt(fan_in), 1/sqrt(fan_in)) init.
    Weights stored as (in_features, out_features) so forward is x @ W + b."""
    dims = [in_dim] + list(nn_arch)
    trunk = []
    for i in range(len(dims) - 1):
        fin, fout = dims[i], dims[i + 1]
        key, kw, kb = jax.random.split(key, 3)
        bound = 1.0 / (fin ** 0.5)
        w = jax.random.uniform(kw, (fin, fout), jnp.float32, -bound, bound)
        b = jax.random.uniform(kb, (fout,), jnp.float32, -bound, bound)
        trunk.append((w, b))
    emb = dims[-1]
    heads = []
    for nd in out_dims:
        key, kw, kb = jax.random.split(key, 3)
        bound = 1.0 / (emb ** 0.5)
        w = jax.random.uniform(kw, (emb, nd), jnp.float32, -bound, bound)
        b = jax.random.uniform(kb, (nd,), jnp.float32, -bound, bound)
        heads.append((w, b))
    return {"trunk": trunk, "heads": heads}


def prepare_params(params, dx, db, lane_pad=128):
    """One-time layout prep for the fused kernel:
       * split trunk layer-0 weight into x / beta halves (folds the concat),
       * reshape biases to (1, Fout),
       * concatenate all head weights/biases and pad the output lane dim to a
         multiple of 128 for unmasked, lane-dense stores."""
    trunk = params["trunk"]
    heads = params["heads"]

    w0, b0 = trunk[0]
    assert w0.shape[0] == dx + db, "trunk[0] fan_in must equal dx + db"

    prepared = {
        "w0x": w0[:dx],
        "w0b": w0[dx:],
        "b0": b0.reshape(1, -1),
        "hidden": [(w, b.reshape(1, -1)) for (w, b) in trunk[1:]],
        "out_dims": [int(w.shape[1]) for (w, _) in heads],
    }

    w_head = jnp.concatenate([w for (w, _) in heads], axis=1)
    b_head = jnp.concatenate([b for (_, b) in heads], axis=0)
    out_total = w_head.shape[1]
    out_pad = ((out_total + lane_pad - 1) // lane_pad) * lane_pad
    if out_pad != out_total:
        w_head = jnp.pad(w_head, ((0, 0), (0, out_pad - out_total)))
        b_head = jnp.pad(b_head, ((0, out_pad - out_total),))
    prepared["w_head"] = w_head
    prepared["b_head"] = b_head.reshape(1, -1)
    return prepared


def _choose_tile_b(B, dx, db, out_pad, hidden_widths, weight_bytes,
                   vmem_budget_bytes):
    """Largest multiple-of-8 batch tile whose double-buffered input/output
    tiles + resident weights + activation working set fit the VMEM budget."""
    # Per-row bytes that scale with tile_b:
    #   x + beta + padded output (double-buffered by the pipeline) ...
    streamed = 2 * 4 * (dx + db + out_pad)
    #   ... plus the widest live activation (compiler-managed, single copy).
    act = 4 * max([dx + db] + list(hidden_widths) + [out_pad])
    per_row = streamed + act
    avail = max(vmem_budget_bytes - weight_bytes, per_row * 8)
    tile_b = (avail // per_row) // 8 * 8
    tile_b = int(max(8, min(tile_b, 4096)))
    # Never tile larger than the (sublane-rounded) batch itself.
    b_ceil = ((B + 7) // 8) * 8
    return min(tile_b, b_ceil)


# ---------------------------------------------------------------------------
# Forward wrapper: one pallas_call, batch tiled and marked parallel.
# ---------------------------------------------------------------------------
def fnnx_beta_forward(prepared, x, beta, *, negative_slope=0.01,
                      matmul_dtype=None, vmem_budget_bytes=24 * 1024 * 1024):
    B, dx = x.shape
    _, db = beta.shape

    w0x, w0b, b0 = prepared["w0x"], prepared["w0b"], prepared["b0"]
    hidden = prepared["hidden"]
    w_head, b_head = prepared["w_head"], prepared["b_head"]
    out_dims = prepared["out_dims"]
    out_pad = w_head.shape[1]
    n_hidden = 1 + len(hidden)

    weight_arrays = [w0x, w0b, b0, w_head, b_head]
    for w, b in hidden:
        weight_arrays += [w, b]
    weight_bytes = sum(int(a.size) * 4 for a in weight_arrays)
    hidden_widths = [w.shape[1] for (w, _) in [(w0x, None)]]  # layer-0 out
    hidden_widths = [w0x.shape[1]] + [w.shape[1] for (w, _) in hidden]

    tile_b = _choose_tile_b(B, dx, db, out_pad, hidden_widths, weight_bytes,
                            vmem_budget_bytes)

    b_padded = ((B + tile_b - 1) // tile_b) * tile_b
    if b_padded != B:
        pad = b_padded - B
        x = jnp.pad(x, ((0, pad), (0, 0)))
        beta = jnp.pad(beta, ((0, pad), (0, 0)))

    flat_inputs = [x, beta, w0x, w0b, b0]
    in_specs = [
        pl.BlockSpec((tile_b, dx), lambda i: (i, 0)),
        pl.BlockSpec((tile_b, db), lambda i: (i, 0)),
        # Weights/biases: same (0,0) block every step -> resident in VMEM.
        pl.BlockSpec(w0x.shape, lambda i: (0, 0)),
        pl.BlockSpec(w0b.shape, lambda i: (0, 0)),
        pl.BlockSpec(b0.shape, lambda i: (0, 0)),
    ]
    for w, b in hidden:
        flat_inputs += [w, b]
        in_specs += [pl.BlockSpec(w.shape, lambda i: (0, 0)),
                     pl.BlockSpec(b.shape, lambda i: (0, 0))]
    flat_inputs += [w_head, b_head]
    in_specs += [pl.BlockSpec(w_head.shape, lambda i: (0, 0)),
                 pl.BlockSpec(b_head.shape, lambda i: (0, 0))]

    kernel = functools.partial(
        _fused_mlp_kernel,
        n_hidden=n_hidden,
        negative_slope=negative_slope,
        matmul_dtype=matmul_dtype,
    )

    # Advisory cost estimate (matmul flops + streamed bytes).
    dims_chain = [dx + db] + hidden_widths + [out_pad]
    flops = sum(2 * b_padded * dims_chain[i] * dims_chain[i + 1]
                for i in range(len(dims_chain) - 1))
    bytes_accessed = (b_padded * (dx + db + out_pad) * 4) + weight_bytes
    cost = pl.CostEstimate(flops=flops, transcendentals=0,
                           bytes_accessed=bytes_accessed)

    y = pl.pallas_call(
        kernel,
        out_shape=jax.ShapeDtypeStruct((b_padded, out_pad), x.dtype),
        grid=(b_padded // tile_b,),
        in_specs=in_specs,
        out_specs=pl.BlockSpec((tile_b, out_pad), lambda i: (i, 0)),
        compiler_params=pltpu.CompilerParams(
            dimension_semantics=("parallel",),     # megacore sharding on v7x
            vmem_limit_bytes=32 * 1024 * 1024,     # fits v7x scoped VMEM
        ),
        cost_estimate=cost,
    )(*flat_inputs)

    # Strip batch padding and split the lane-padded head block back into the
    # per-head logits list (matches the PyTorch forward's list return).
    y = y[:B]
    outs, off = [], 0
    for d in out_dims:
        outs.append(y[:, off:off + d])
        off += d
    return outs


# ---------------------------------------------------------------------------
# Pure-JAX reference (PyTorch semantics)
# ---------------------------------------------------------------------------
def fnnx_beta_reference(params, x, beta, negative_slope=0.01):
    h = jnp.concatenate([x, beta], axis=1)
    for w, b in params["trunk"]:
        h = h @ w + b
        h = jnp.where(h > 0, h, negative_slope * h)
    return [h @ w + b for (w, b) in params["heads"]]


if __name__ == "__main__":
    # Small shapes consistent with the module:
    # FNNXBeta(in_dim=24, out_dims=[8, 4], nn_arch=[32, 24]) with x:(8,16), beta:(8,8)
    dx, db = 16, 8
    in_dim = dx + db
    nn_arch = [32, 24]
    out_dims = [8, 4]
    batch = 8

    key = jax.random.PRNGKey(0)
    key, kx, kb = jax.random.split(key, 3)
    x = jax.random.normal(kx, (batch, dx), dtype=jnp.float32)
    beta = jax.random.normal(kb, (batch, db), dtype=jnp.float32)

    params = init_params(key, in_dim, out_dims, nn_arch)
    prepared = prepare_params(params, dx, db)

    outs = fnnx_beta_forward(prepared, x, beta)
    outs = [jax.block_until_ready(o) for o in outs]

    refs = fnnx_beta_reference(params, x, beta)
    assert len(outs) == len(out_dims)
    for o, r, d in zip(outs, refs, out_dims):
        assert o.shape == (batch, d), f"bad shape {o.shape}"
        assert jnp.allclose(o, r, atol=1e-4, rtol=1e-4), "mismatch vs reference"

    print("KERNEL_OK")
</pallas_src>

<mosaic_0001>
module attributes {stable_mosaic.version = 11 : i64} {
  func.func @_fused_mlp_kernel(%arg0: i32, %arg1: memref<8x16xf32, #tpu.memory_space<vmem>>, %arg2: memref<8x8xf32, #tpu.memory_space<vmem>>, %arg3: memref<16x32xf32, #tpu.memory_space<vmem>>, %arg4: memref<8x32xf32, #tpu.memory_space<vmem>>, %arg5: memref<1x32xf32, #tpu.memory_space<vmem>>, %arg6: memref<32x24xf32, #tpu.memory_space<vmem>>, %arg7: memref<1x24xf32, #tpu.memory_space<vmem>>, %arg8: memref<24x128xf32, #tpu.memory_space<vmem>>, %arg9: memref<1x128xf32, #tpu.memory_space<vmem>>, %arg10: memref<8x128xf32, #tpu.memory_space<vmem>>) attributes {dimension_semantics = [#tpu.dimension_semantics<parallel>], iteration_bounds = array<i64: 1>, scalar_prefetch = 0 : i64, scratch_operands = 0 : i64, tpu.core_type = #tpu.core_type<tc>, window_params = [{transform_indices = @transform_0, window_bounds = array<i64: 8, 16>}, {transform_indices = @transform_1, window_bounds = array<i64: 8, 8>}, {pipeline_mode = #tpu.pipeline_mode<synchronous>, transform_indices = @transform_2, window_bounds = array<i64: 16, 32>}, {pipeline_mode = #tpu.pipeline_mode<synchronous>, transform_indices = @transform_3, window_bounds = array<i64: 8, 32>}, {pipeline_mode = #tpu.pipeline_mode<synchronous>, transform_indices = @transform_4, window_bounds = array<i64: 1, 32>}, {pipeline_mode = #tpu.pipeline_mode<synchronous>, transform_indices = @transform_5, window_bounds = array<i64: 32, 24>}, {pipeline_mode = #tpu.pipeline_mode<synchronous>, transform_indices = @transform_6, window_bounds = array<i64: 1, 24>}, {pipeline_mode = #tpu.pipeline_mode<synchronous>, transform_indices = @transform_7, window_bounds = array<i64: 24, 128>}, {pipeline_mode = #tpu.pipeline_mode<synchronous>, transform_indices = @transform_8, window_bounds = array<i64: 1, 128>}, {transform_indices = @transform_9, window_bounds = array<i64: 8, 128>}]} {
    %c0 = arith.constant 0 : index
    %c0_0 = arith.constant 0 : index
    %0 = vector.load %arg1[%c0, %c0_0] : memref<8x16xf32, #tpu.memory_space<vmem>>, vector<8x16xf32>
    %c0_1 = arith.constant 0 : index
    %c0_2 = arith.constant 0 : index
    %1 = vector.load %arg3[%c0_1, %c0_2] : memref<16x32xf32, #tpu.memory_space<vmem>>, vector<16x32xf32>
    %cst = arith.constant dense<0.000000e+00> : vector<8x32xf32>
    %2 = tpu.matmul %0, %1, %cst {dimension_numbers = #tpu.dot_dimension_numbers<[1], [0], [0], [1], [0, 0, 1, 1], [], []>} : vector<8x16xf32>, vector<16x32xf32>, vector<8x32xf32> -> vector<8x32xf32>
    %c0_3 = arith.constant 0 : index
    %c0_4 = arith.constant 0 : index
    %3 = vector.load %arg2[%c0_3, %c0_4] : memref<8x8xf32, #tpu.memory_space<vmem>>, vector<8x8xf32>
    %c0_5 = arith.constant 0 : index
    %c0_6 = arith.constant 0 : index
    %4 = vector.load %arg4[%c0_5, %c0_6] : memref<8x32xf32, #tpu.memory_space<vmem>>, vector<8x32xf32>
    %cst_7 = arith.constant dense<0.000000e+00> : vector<8x32xf32>
    %5 = tpu.matmul %3, %4, %cst_7 {dimension_numbers = #tpu.dot_dimension_numbers<[1], [0], [0], [1], [0, 0, 1, 1], [], []>} : vector<8x8xf32>, vector<8x32xf32>, vector<8x32xf32> -> vector<8x32xf32>
    %6 = arith.addf %2, %5 : vector<8x32xf32>
    %c0_8 = arith.constant 0 : index
    %c0_9 = arith.constant 0 : index
    %7 = vector.load %arg5[%c0_8, %c0_9] : memref<1x32xf32, #tpu.memory_space<vmem>>, vector<1x32xf32>
    %8 = vector.broadcast %7 : vector<1x32xf32> to vector<8x32xf32>
    %9 = arith.addf %6, %8 : vector<8x32xf32>
    %cst_10 = arith.constant 0.000000e+00 : f32
    %10 = vector.broadcast %cst_10 : f32 to vector<8x32xf32>
    %11 = arith.cmpf ogt, %9, %10 : vector<8x32xf32>
    %cst_11 = arith.constant 0.00999999977 : f32
    %12 = vector.broadcast %cst_11 : f32 to vector<8x32xf32>
    %13 = arith.mulf %12, %9 : vector<8x32xf32>
    %14 = arith.select %11, %9, %13 : vector<8x32xi1>, vector<8x32xf32>
    %c0_12 = arith.constant 0 : index
    %c0_13 = arith.constant 0 : index
    %15 = vector.load %arg6[%c0_12, %c0_13] : memref<32x24xf32, #tpu.memory_space<vmem>>, vector<32x24xf32>
    %cst_14 = arith.constant dense<0.000000e+00> : vector<8x24xf32>
    %16 = tpu.matmul %14, %15, %cst_14 {dimension_numbers = #tpu.dot_dimension_numbers<[1], [0], [0], [1], [0, 0, 1, 1], [], []>} : vector<8x32xf32>, vector<32x24xf32>, vector<8x24xf32> -> vector<8x24xf32>
    %c0_15 = arith.constant 0 : index
    %c0_16 = arith.constant 0 : index
    %17 = vector.load %arg7[%c0_15, %c0_16] : memref<1x24xf32, #tpu.memory_space<vmem>>, vector<1x24xf32>
    %18 = vector.broadcast %17 : vector<1x24xf32> to vector<8x24xf32>
    %19 = arith.addf %16, %18 : vector<8x24xf32>
    %cst_17 = arith.constant 0.000000e+00 : f32
    %20 = vector.broadcast %cst_17 : f32 to vector<8x24xf32>
    %21 = arith.cmpf ogt, %19, %20 : vector<8x24xf32>
    %cst_18 = arith.constant 0.00999999977 : f32
    %22 = vector.broadcast %cst_18 : f32 to vector<8x24xf32>
    %23 = arith.mulf %22, %19 : vector<8x24xf32>
    %24 = arith.select %21, %19, %23 : vector<8x24xi1>, vector<8x24xf32>
    %c0_19 = arith.constant 0 : index
    %c0_20 = arith.constant 0 : index
    %25 = vector.load %arg8[%c0_19, %c0_20] : memref<24x128xf32, #tpu.memory_space<vmem>>, vector<24x128xf32>
    %cst_21 = arith.constant dense<0.000000e+00> : vector<8x128xf32>
    %26 = tpu.matmul %24, %25, %cst_21 {dimension_numbers = #tpu.dot_dimension_numbers<[1], [0], [0], [1], [0, 0, 1, 1], [], []>} : vector<8x24xf32>, vector<24x128xf32>, vector<8x128xf32> -> vector<8x128xf32>
    %c0_22 = arith.constant 0 : index
    %c0_23 = arith.constant 0 : index
    %27 = vector.load %arg9[%c0_22, %c0_23] : memref<1x128xf32, #tpu.memory_space<vmem>>, vector<1x128xf32>
    %28 = vector.broadcast %27 : vector<1x128xf32> to vector<8x128xf32>
    %29 = arith.addf %26, %28 : vector<8x128xf32>
    %c0_24 = arith.constant 0 : index
    %c0_25 = arith.constant 0 : index
    %30 = vector.load %arg10[%c0_24, %c0_25] : memref<8x128xf32, #tpu.memory_space<vmem>>, vector<8x128xf32>
    tpu.vector_store %arg10[%c0_24, %c0_25], %29 {strides = array<i32>} : memref<8x128xf32, #tpu.memory_space<vmem>>, vector<8x128xf32>,
    return
  }
  func.func @transform_0(%arg0: i32) -> (i32, i32) {
    %c0_i32 = arith.constant 0 : i32
    %c0_i32_0 = arith.constant 0 : i32
    return %arg0, %c0_i32 : i32, i32
  }
  func.func @transform_1(%arg0: i32) -> (i32, i32) {
    %c0_i32 = arith.constant 0 : i32
    %c0_i32_0 = arith.constant 0 : i32
    return %arg0, %c0_i32 : i32, i32
  }
  func.func @transform_2(%arg0: i32) -> (i32, i32) {
    %c0_i32 = arith.constant 0 : i32
    %c0_i32_0 = arith.constant 0 : i32
    %c0_i32_1 = arith.constant 0 : i32
    return %c0_i32, %c0_i32_0 : i32, i32
  }
  func.func @transform_3(%arg0: i32) -> (i32, i32) {
    %c0_i32 = arith.constant 0 : i32
    %c0_i32_0 = arith.constant 0 : i32
    %c0_i32_1 = arith.constant 0 : i32
    return %c0_i32, %c0_i32_0 : i32, i32
  }
  func.func @transform_4(%arg0: i32) -> (i32, i32) {
    %c0_i32 = arith.constant 0 : i32
    %c0_i32_0 = arith.constant 0 : i32
    %c0_i32_1 = arith.constant 0 : i32
    return %c0_i32, %c0_i32_0 : i32, i32
  }
  func.func @transform_5(%arg0: i32) -> (i32, i32) {
    %c0_i32 = arith.constant 0 : i32
    %c0_i32_0 = arith.constant 0 : i32
    %c0_i32_1 = arith.constant 0 : i32
    return %c0_i32, %c0_i32_0 : i32, i32
  }
  func.func @transform_6(%arg0: i32) -> (i32, i32) {
    %c0_i32 = arith.constant 0 : i32
    %c0_i32_0 = arith.constant 0 : i32
    %c0_i32_1 = arith.constant 0 : i32
    return %c0_i32, %c0_i32_0 : i32, i32
  }
  func.func @transform_7(%arg0: i32) -> (i32, i32) {
    %c0_i32 = arith.constant 0 : i32
    %c0_i32_0 = arith.constant 0 : i32
    %c0_i32_1 = arith.constant 0 : i32
    return %c0_i32, %c0_i32_0 : i32, i32
  }
  func.func @transform_8(%arg0: i32) -> (i32, i32) {
    %c0_i32 = arith.constant 0 : i32
    %c0_i32_0 = arith.constant 0 : i32
    %c0_i32_1 = arith.constant 0 : i32
    return %c0_i32, %c0_i32_0 : i32, i32
  }
  func.func @transform_9(%arg0: i32) -> (i32, i32) {
    %c0_i32 = arith.constant 0 : i32
    %c0_i32_0 = arith.constant 0 : i32
    return %arg0, %c0_i32 : i32, i32
  }
}

</mosaic_0001>

<bundles_post_ra>
// kernel: tpu_custom_call.1
= control target key start
LH: loop header
LB: loop body
LE: loop exit
PB: predicated region body
PF: predicated region fallthrough
CT: control target
= control target key end

     0   :  { %14 = vsyncpa [#allocation3], 0  ;;  %s604_s0 = inlined_call_operand.vmem [shape: f32[8,16], index: 0, kind: input, shape index: {}]   ;;  %s605_s1 = inlined_call_operand.vmem [shape: f32[8,8], index: 1, kind: input, shape index: {}]   ;;  %s606_s2 = inlined_call_operand.vmem [shape: f32[16,32], index: 2, kind: input, shape index: {}]   ;;  %s607_s3 = inlined_call_operand.hbm [shape: f32[8,32], index: 3, kind: input, shape index: {}]   ;;  %s608_s4 = inlined_call_operand.vmem [shape: f32[1,32], index: 4, kind: input, shape index: {}]   ;;  %s609_s5 = inlined_call_operand.vmem [shape: f32[32,24], index: 5, kind: input, shape index: {}]   ;;  %s610_s6 = inlined_call_operand.vmem [shape: f32[1,24], index: 6, kind: input, shape index: {}]   ;;  %s611_s7 = inlined_call_operand.vmem [shape: f32[24,128], index: 7, kind: input, shape index: {}]   ;;  %s612_s8 = inlined_call_operand.vmem [shape: f32[1,128], index: 8, kind: input, shape index: {}]   ;;  %s613_s9 = inlined_call_operand.hbm [shape: f32[8,128], index: 9, kind: output, shape index: {}]  }
   0x1   :  { %15 = vsyncpa [#allocation4], 0  ;;  %s498_s30 = smov [#allocation2]  }
   0x2   :  { %s28_s10 = sshll.u32 %s498_s30, 4  ;;  %s29_s10 = int_to_ptr.vmem [resolvable:$true] %s28_s10 }
   0x3   :  { %s462_s11 = scalar_lea.vmem %s29_s10, 128  ;;  %p467_p1 = scmp.lt.s32.totalorder %s29_s10, %s29_s10 }
   0x4   :  { %p463_p0 = scmp.ne.s32.totalorder %s29_s10, %s462_s11  ;;  %p468_p2 = scmp.lt.s32.totalorder %s462_s11, %s462_s11 }
   0x6   :  { %p469_p3 = por %p468_p2, %p467_p1 }
   0x8   :  { %p470_p4 = pnand %p469_p3, %p463_p0 }
   0xa   :  { %473 = shalt.err (!%p470_p4)
}
   0xb   :  { %31 = dma.hbm_to_vmem [thread:$0]  %s607_s3, 128, %s29_s10, [#allocation3]  }
   0xc   :  { %494 = dma.done.wait [#allocation3], 128  }
   0xd   :  { %495 = vsyncadd [#allocation3], 4294967168  ;;  %v499_v0 = vmov 0.0   ;;  %vm500_vm0 = vmmov 0   ;;  %vm50_vm1 = vcmask 64512   ;;  %v49_v1 = vld [vmem:[#allocation2] sm:$0xff] }
   0xe   :  { %418 = vmatprep.subr.mxu0 %v499_v0  ;;  %423 = vmatprep.subr.mxu1 %v499_v0  ;;  %v47_v2 = vld [vmem:[%s606_s2 + $0x8] sm:$0xff]  ;;  %v48_v3 = vld [vmem:[%s605_s1] sm:$0xff]  ;;  %vm124_vm2 = vcmask 130048   ;;  %v212_v6 = vld [vmem:[%s609_s5 + $0x18] sm:$0xff]  ;;  %vm220_vm4 = vcmask 261120   ;;  %vm307_vm6 = vcmask 195584  }
   0xf   :  { %420 = vmatprep.mubr.msk.f32.mxu0 %vm500_vm0, %v499_v0  ;;  %427 = vmatprep.mubr.msk.f32.mxu1 %vm500_vm0, %v499_v0  ;;  %v46_v4 = vld [vmem:[%s606_s2] sm:$0xff]  ;;  %v211_v7 = vld [vmem:[%s609_s5 + $0x10] sm:$0xff]  ;;  %v210_v8 = vld [vmem:[%s609_s5 + $0x8] sm:$0xff]  ;;  %s501_s15 = smov [#allocation5]  }
  0x10   :  { %419 = vmatpush3.msra.mxu0 %v49_v1  ;;  %424 = vmatpush3.msra.mxu1 %v47_v2  ;;  %v45_v5 = vld [vmem:[%s604_s0] sm:$0xff]  ;;  %v299_v19 = vld [vmem:[%s611_s7 + $0x10] sm:$0xff]  ;;  %v298_v20 = vld [vmem:[%s611_s7 + $0x8] sm:$0xff]  ;;  %s388_s16 = sshll.u32 %s501_s15, 4  ;;  %s389_s16 = int_to_ptr.vmem [resolvable:$true] %s388_s16 }
  0x11   :  { %421 = vmatmul.mubr.msk.f32.vlgmr.msra.gmra.mxu0 %vm50_vm1, %v48_v3  ;;  %425 = vmatprep.subr.mxu1 %v499_v0  ;;  %v209_v9 = vld [vmem:[%s609_s5] sm:$0xff]  ;;  %p479_p6 = scmp.lt.s32.totalorder %s389_s16, %s389_s16 }
  0x12   :  { %426 = vmatpush3.msra.mxu1 %v46_v4  ;;  %430 = vmatprep.subr.mxu0 %v499_v0  ;;  %v399_v13 = vld [vmem:[%s608_s4] ss:$0 sm:$0xff] }
  0x13   :  { %428 = vmatmul.mubr.msk.f32.vlgmr.msra.gmra.mxu1 %vm124_vm2, %v45_v5  ;;  %438 = vmatprep.mubr.msk.f32.mxu0 %vm500_vm0, %v499_v0  ;;  %v297_v21 = vld [vmem:[%s611_s7] sm:$0xff] }
  0x14   :  { %441 = vmatprep.subr.mxu1 %v499_v0  ;;  %447 = vmatprep.mubr.msk.f32.mxu1 %vm500_vm0, %v499_v0  ;;  %v400_v22 = vld [vmem:[%s610_s6] ss:$0 sm:$0xff]  ;;  %s474_s6 = scalar_lea.vmem %s389_s16, 128 }
  0x15   :  { %431 = vmatpush3.msra.mxu0 %v212_v6  ;;  %442 = vmatpush3.msra.mxu1 %v299_v19  ;;  %v402_v28 = vld [vmem:[%s612_s8] ss:$0 sm:$0xff]  ;;  %p475_p5 = scmp.ne.s32.totalorder %s389_s16, %s474_s6  ;;  %p480_p7 = scmp.lt.s32.totalorder %s474_s6, %s474_s6 }
  0x16   :  { %432 = vmatprep.subr.mxu0 %v499_v0  ;;  %443 = vmatprep.subr.mxu1 %v499_v0 }
  0x17   :  { %433 = vmatpush3.msra.mxu0 %v211_v7  ;;  %444 = vmatpush3.msra.mxu1 %v298_v20  ;;  %p481_p8 = por %p480_p7, %p479_p6 }
  0x18   :  { %434 = vmatprep.subr.mxu0 %v499_v0  ;;  %445 = vmatprep.subr.mxu1 %v499_v0 }
  0x19   :  { %435 = vmatpush3.msra.mxu0 %v210_v8  ;;  %446 = vmatpush3.msra.mxu1 %v297_v21  ;;  %p482_p9 = pnand %p481_p8, %p475_p5 }
  0x1a   :  { %436 = vmatprep.subr.mxu0 %v499_v0 }
  0x1b   :  { %437 = vmatpush3.msra.mxu0 %v209_v9 }
  0xd1   :  { %v120_v10 = vpop.f32.mrf.mxu0 }
  0xd3   :  { %v422_v11 = vpop.f32.mrf.mxu0  ;;  %v194_v12 = vpop.f32.mrf.mxu1 }
  0xd4   :  { %v195_v14 = vadd.f32 %v194_v12, %v120_v10 }
  0xd5   :  { %v429_v15 = vpop.f32.mrf.mxu1 }
  0xd6   :  { %v205_v16 = vadd.f32 %v399_v13, %v195_v14 }
  0xd8   :  { %vm206_vm3 = vcmp.gt.f32.partialorder %v205_v16, 0.0  ;;  %v207_v17 = vmul.f32 0.01, %v205_v16 }
  0xda   :  { %v208_v18 = vsel %vm206_vm3, %v205_v16, %v207_v17 }
  0xdb   :  { %439 = vmatmul.mubr.msk.f32.vlgmr.msra.gmra.mxu0 %vm220_vm4, %v208_v18 }
 0x19b   :  { %v290_v23 = vpop.f32.mrf.mxu0 }
 0x19c   :  { %v291_v24 = vadd.f32 %v400_v22, %v290_v23 }
 0x19d   :  { %v440_v25 = vpop.f32.mrf.mxu0 }
 0x19e   :  { %vm294_vm5 = vcmp.gt.f32.partialorder %v291_v24, 0.0  ;;  %v295_v26 = vmul.f32 0.01, %v291_v24 }
 0x1a0   :  { %v296_v27 = vsel %vm294_vm5, %v291_v24, %v295_v26 }
 0x1a1   :  { %448 = vmatmul.mubr.msk.f32.vlgmr.msra.gmra.mxu1 %vm307_vm6, %v296_v27 }
 0x261   :  { %v377_v29 = vpop.f32.mrf.mxu1 }
 0x262   :  { %v378_v30 = vadd.f32 %v402_v28, %v377_v29 }
 0x263   :  { %v449_v31 = vpop.f32.mrf.mxu1 }
 0x264   :  { %381 = vst [vmem:[#allocation5] sm:$0xff] %v378_v30 }
 0x265   :  { %485 = shalt.err (!%p482_p9)
}
 0x266   :  { %391 = dma.vmem_to_hbm [thread:$0]  %s389_s16, 128, %s613_s9, [#allocation4]  }
 0x267   :  { %496 = dma.done.wait [#allocation4], 128  }
 0x268   :  { %497 = vsyncadd [#allocation4], 4294967168 }
 0x269   :  { %395 = vsyncpa [#allocation3], 1 }
 0x26a   :  { %396 = vsyncpa [#allocation4], 1 }

</bundles_post_ra>
